<compile_context>
chip_gen: v7x
topology: tpu7x:2x2x1
jax: 0.10.0
libtpu: 0.0.40
codegen_flags: <defaults>
</compile_context>

<pallas_src>
import functools
import math

import jax
import jax.numpy as jnp
from jax.experimental import pallas as pl
from jax.experimental.pallas import tpu as pltpu


def mha_kernel(q_ref, k_ref, v_ref,
               wq_ref, wk_ref, wv_ref,
               bq_ref, bk_ref, bv_ref,
               wo_ref, bo_ref, out_ref, *, num_heads):
    # Block shapes: q/k/v_ref [1,S,D]; w*_ref [D,D]; b*_ref [1,D]; out_ref [1,S,D].
    _, S, D = q_ref.shape
    H = num_heads
    DK = D // H
    scale = 1.0 / math.sqrt(DK)
    in_dt = q_ref.dtype          # MXU operand dtype (f32 here; bf16 at real sizes)

    q = q_ref[0]                 # [S, D]
    k = k_ref[0]
    v = v_ref[0]

    # --- Input projections: three full-width MXU matmuls, f32 accumulation. ---
    Q = (jnp.dot(q, wq_ref[...], preferred_element_type=jnp.float32)
         + bq_ref[...]).astype(in_dt)                                   # [S, D]
    K = (jnp.dot(k, wk_ref[...], preferred_element_type=jnp.float32)
         + bk_ref[...]).astype(in_dt)
    V = (jnp.dot(v, wv_ref[...], preferred_element_type=jnp.float32)
         + bv_ref[...]).astype(in_dt)

    # --- One-time head-major relayout: [S, D] -> [H, S, d_k]. ---
    # H static lane slices + a leading-axis stack per tensor; all compute below
    # is head-batched (no per-head unrolled matmuls or softmaxes).
    # TODO(synk): at real BERT sizes put heads on a grid axis instead (BlockSpec
    # slices the weights per head from HBM) so no in-kernel head relayout at all.
    def to_heads(x):
        return jnp.stack([x[:, h * DK:(h + 1) * DK] for h in range(H)], axis=0)

    Qh = to_heads(Q)             # [H, S, DK]
    Kh = to_heads(K)
    Vh = to_heads(V)

    # --- Scores for all heads with ONE batched dot_general (contract last dims,
    # no explicit K transpose), then ONE softmax over the batched tensor. ---
    s = jnp.einsum('hqd,hkd->hqk', Qh, Kh,
                   preferred_element_type=jnp.float32) * scale          # [H, S, S]
    s = s - jnp.max(s, axis=-1, keepdims=True)
    e = jnp.exp(s)
    p = e / jnp.sum(e, axis=-1, keepdims=True)   # exact divide (parity over approx recip)
    # TODO(synk): attention mask (mask != None) and training-mode dropout on p
    # are not implemented (eval-mode, mask=None semantics only).

    # --- PV for all heads with ONE batched dot_general. ---
    o = jnp.einsum('hqk,hkd->hqd', p.astype(in_dt), Vh,
                   preferred_element_type=jnp.float32)                  # [H, S, DK]

    # --- Re-assemble heads (single lane concat) + ONE output-projection matmul. ---
    x = jnp.concatenate([o[h] for h in range(H)], axis=-1)              # [S, D]
    out = jnp.dot(x.astype(in_dt), wo_ref[...],
                  preferred_element_type=jnp.float32) + bo_ref[...]     # [S, D]

    # Single store per grid step.  (At real BERT sizes D is a multiple of 128,
    # so this store is lane-dense/unmasked automatically.)
    out_ref[0] = out.astype(out_ref.dtype)


def multi_headed_attention(q, k, v, params, *, num_heads,
                           compute_dtype=jnp.float32):
    """q, k, v: [B, S, D]; params: dict of [D,D] weights / [1,D] biases.

    Returns [B, S, D] float32 (eval mode, mask=None).  Weights are stored
    pre-transposed as [D_in, D_out] so y = x @ W + b (== PyTorch x @ W.T + b).
    """
    B, S, D = q.shape
    assert k.shape == (B, S, D) and v.shape == (B, S, D)
    assert D % num_heads == 0

    # MXU operands in compute_dtype.  f32 at this toy size for parity with the
    # reference; pass jnp.bfloat16 at real BERT sizes (accumulation stays f32
    # in-kernel, softmax math stays f32).
    cast = lambda a: a.astype(compute_dtype)
    args = (cast(q), cast(k), cast(v),
            cast(params["wq"]), cast(params["wk"]), cast(params["wv"]),
            params["bq"], params["bk"], params["bv"],
            cast(params["wo"]), params["bo"])

    batch_spec = pl.BlockSpec((1, S, D), lambda b: (b, 0, 0))
    w_spec = pl.BlockSpec((D, D), lambda b: (0, 0))
    b_spec = pl.BlockSpec((1, D), lambda b: (0, 0))

    return pl.pallas_call(
        functools.partial(mha_kernel, num_heads=num_heads),
        out_shape=jax.ShapeDtypeStruct((B, S, D), jnp.float32),
        grid_spec=pltpu.PrefetchScalarGridSpec(
            num_scalar_prefetch=0,
            grid=(B,),                                        # one step per batch element
            in_specs=[batch_spec, batch_spec, batch_spec,     # q, k, v
                      w_spec, w_spec, w_spec,                 # wq, wk, wv
                      b_spec, b_spec, b_spec,                 # bq, bk, bv
                      w_spec, b_spec],                        # wo, bo
            out_specs=batch_spec,
        ),
        # Batch steps are independent -> v7x can shard them across its two
        # TensorCores; no effect on single-TC v5e/v6e.
        compiler_params=pltpu.CompilerParams(
            dimension_semantics=("parallel",)),
        # TODO(synk): at real BERT sizes also tile S into row blocks, set
        # vmem_limit_bytes explicitly, and re-budget tiles for v7x's 64 MiB
        # VMEM / v5e's 16 MiB scoped default.
    )(*args)


def reference_mha(q, k, v, params, num_heads):
    """Pure-JAX reference mirroring the PyTorch module (eval mode, mask=None)."""
    B, S, D = q.shape
    DK = D // num_heads

    def lin(x, w, b):
        return x @ w + b

    Q = lin(q, params["wq"], params["bq"]).reshape(B, S, num_heads, DK).transpose(0, 2, 1, 3)
    K = lin(k, params["wk"], params["bk"]).reshape(B, S, num_heads, DK).transpose(0, 2, 1, 3)
    V = lin(v, params["wv"], params["bv"]).reshape(B, S, num_heads, DK).transpose(0, 2, 1, 3)
    scores = jnp.einsum("bhqd,bhkd->bhqk", Q, K) / math.sqrt(DK)
    p = jax.nn.softmax(scores, axis=-1)
    x = jnp.einsum("bhqk,bhkd->bhqd", p, V)
    x = x.transpose(0, 2, 1, 3).reshape(B, S, D)
    return lin(x, params["wo"], params["bo"])


def init_params(key, d_model):
    ks = jax.random.split(key, 8)
    bound = 1.0 / math.sqrt(d_model)   # PyTorch nn.Linear default init range

    def w(k):
        return jax.random.uniform(k, (d_model, d_model), jnp.float32, -bound, bound)

    def bias(k):
        return jax.random.uniform(k, (1, d_model), jnp.float32, -bound, bound)

    return {
        "wq": w(ks[0]), "wk": w(ks[1]), "wv": w(ks[2]), "wo": w(ks[3]),
        "bq": bias(ks[4]), "bk": bias(ks[5]), "bv": bias(ks[6]), "bo": bias(ks[7]),
    }


if __name__ == "__main__":
    B, S, D, H = 2, 8, 32, 4   # batch, seq, d_model, heads (d_model % h == 0)
    key = jax.random.PRNGKey(0)
    kq, kk, kv, kp = jax.random.split(key, 4)
    q = jax.random.normal(kq, (B, S, D), jnp.float32)
    k = jax.random.normal(kk, (B, S, D), jnp.float32)
    v = jax.random.normal(kv, (B, S, D), jnp.float32)
    params = init_params(kp, D)

    out = multi_headed_attention(q, k, v, params, num_heads=H)
    out = jax.block_until_ready(out)

    ref = reference_mha(q, k, v, params, H)
    assert out.shape == (B, S, D)
    # Softmax now uses an exact divide (no approx reciprocal); the remaining
    # tolerance headroom covers MXU f32 multi-pass vs XLA default-precision
    # matmul differences, not any softmax approximation.
    assert jnp.allclose(out, ref, atol=2e-3, rtol=2e-3), "mismatch vs reference"
    print("KERNEL_OK")
</pallas_src>

<mosaic_0001>
module attributes {stable_mosaic.version = 11 : i64} {
  func.func @mha_kernel(%arg0: i32, %arg1: memref<1x8x32xf32, #tpu.memory_space<vmem>>, %arg2: memref<1x8x32xf32, #tpu.memory_space<vmem>>, %arg3: memref<1x8x32xf32, #tpu.memory_space<vmem>>, %arg4: memref<32x32xf32, #tpu.memory_space<vmem>>, %arg5: memref<32x32xf32, #tpu.memory_space<vmem>>, %arg6: memref<32x32xf32, #tpu.memory_space<vmem>>, %arg7: memref<1x32xf32, #tpu.memory_space<vmem>>, %arg8: memref<1x32xf32, #tpu.memory_space<vmem>>, %arg9: memref<1x32xf32, #tpu.memory_space<vmem>>, %arg10: memref<32x32xf32, #tpu.memory_space<vmem>>, %arg11: memref<1x32xf32, #tpu.memory_space<vmem>>, %arg12: memref<1x8x32xf32, #tpu.memory_space<vmem>>) attributes {dimension_semantics = [#tpu.dimension_semantics<parallel>], iteration_bounds = array<i64: 2>, scalar_prefetch = 0 : i64, scratch_operands = 0 : i64, tpu.core_type = #tpu.core_type<tc>, window_params = [{transform_indices = @transform_0, window_bounds = array<i64: 1, 8, 32>}, {transform_indices = @transform_1, window_bounds = array<i64: 1, 8, 32>}, {transform_indices = @transform_2, window_bounds = array<i64: 1, 8, 32>}, {pipeline_mode = #tpu.pipeline_mode<synchronous>, transform_indices = @transform_3, window_bounds = array<i64: 32, 32>}, {pipeline_mode = #tpu.pipeline_mode<synchronous>, transform_indices = @transform_4, window_bounds = array<i64: 32, 32>}, {pipeline_mode = #tpu.pipeline_mode<synchronous>, transform_indices = @transform_5, window_bounds = array<i64: 32, 32>}, {pipeline_mode = #tpu.pipeline_mode<synchronous>, transform_indices = @transform_6, window_bounds = array<i64: 1, 32>}, {pipeline_mode = #tpu.pipeline_mode<synchronous>, transform_indices = @transform_7, window_bounds = array<i64: 1, 32>}, {pipeline_mode = #tpu.pipeline_mode<synchronous>, transform_indices = @transform_8, window_bounds = array<i64: 1, 32>}, {pipeline_mode = #tpu.pipeline_mode<synchronous>, transform_indices = @transform_9, window_bounds = array<i64: 32, 32>}, {pipeline_mode = #tpu.pipeline_mode<synchronous>, transform_indices = @transform_10, window_bounds = array<i64: 1, 32>}, {transform_indices = @transform_11, window_bounds = array<i64: 1, 8, 32>}]} {
    %c0 = arith.constant 0 : index
    %c0_0 = arith.constant 0 : index
    %c0_1 = arith.constant 0 : index
    %0 = vector.load %arg1[%c0, %c0_0, %c0_1] : memref<1x8x32xf32, #tpu.memory_space<vmem>>, vector<1x8x32xf32>
    %1 = vector.shape_cast %0 : vector<1x8x32xf32> to vector<8x32xf32>
    %c0_2 = arith.constant 0 : index
    %c0_3 = arith.constant 0 : index
    %c0_4 = arith.constant 0 : index
    %2 = vector.load %arg2[%c0_2, %c0_3, %c0_4] : memref<1x8x32xf32, #tpu.memory_space<vmem>>, vector<1x8x32xf32>
    %3 = vector.shape_cast %2 : vector<1x8x32xf32> to vector<8x32xf32>
    %c0_5 = arith.constant 0 : index
    %c0_6 = arith.constant 0 : index
    %c0_7 = arith.constant 0 : index
    %4 = vector.load %arg3[%c0_5, %c0_6, %c0_7] : memref<1x8x32xf32, #tpu.memory_space<vmem>>, vector<1x8x32xf32>
    %5 = vector.shape_cast %4 : vector<1x8x32xf32> to vector<8x32xf32>
    %c0_8 = arith.constant 0 : index
    %c0_9 = arith.constant 0 : index
    %6 = vector.load %arg4[%c0_8, %c0_9] : memref<32x32xf32, #tpu.memory_space<vmem>>, vector<32x32xf32>
    %cst = arith.constant dense<0.000000e+00> : vector<8x32xf32>
    %7 = tpu.matmul %1, %6, %cst {dimension_numbers = #tpu.dot_dimension_numbers<[1], [0], [0], [1], [0, 0, 1, 1], [], []>} : vector<8x32xf32>, vector<32x32xf32>, vector<8x32xf32> -> vector<8x32xf32>
    %c0_10 = arith.constant 0 : index
    %c0_11 = arith.constant 0 : index
    %8 = vector.load %arg7[%c0_10, %c0_11] : memref<1x32xf32, #tpu.memory_space<vmem>>, vector<1x32xf32>
    %9 = vector.broadcast %8 : vector<1x32xf32> to vector<8x32xf32>
    %10 = arith.addf %7, %9 : vector<8x32xf32>
    %c0_12 = arith.constant 0 : index
    %c0_13 = arith.constant 0 : index
    %11 = vector.load %arg5[%c0_12, %c0_13] : memref<32x32xf32, #tpu.memory_space<vmem>>, vector<32x32xf32>
    %cst_14 = arith.constant dense<0.000000e+00> : vector<8x32xf32>
    %12 = tpu.matmul %3, %11, %cst_14 {dimension_numbers = #tpu.dot_dimension_numbers<[1], [0], [0], [1], [0, 0, 1, 1], [], []>} : vector<8x32xf32>, vector<32x32xf32>, vector<8x32xf32> -> vector<8x32xf32>
    %c0_15 = arith.constant 0 : index
    %c0_16 = arith.constant 0 : index
    %13 = vector.load %arg8[%c0_15, %c0_16] : memref<1x32xf32, #tpu.memory_space<vmem>>, vector<1x32xf32>
    %14 = vector.broadcast %13 : vector<1x32xf32> to vector<8x32xf32>
    %15 = arith.addf %12, %14 : vector<8x32xf32>
    %c0_17 = arith.constant 0 : index
    %c0_18 = arith.constant 0 : index
    %16 = vector.load %arg6[%c0_17, %c0_18] : memref<32x32xf32, #tpu.memory_space<vmem>>, vector<32x32xf32>
    %cst_19 = arith.constant dense<0.000000e+00> : vector<8x32xf32>
    %17 = tpu.matmul %5, %16, %cst_19 {dimension_numbers = #tpu.dot_dimension_numbers<[1], [0], [0], [1], [0, 0, 1, 1], [], []>} : vector<8x32xf32>, vector<32x32xf32>, vector<8x32xf32> -> vector<8x32xf32>
    %c0_20 = arith.constant 0 : index
    %c0_21 = arith.constant 0 : index
    %18 = vector.load %arg9[%c0_20, %c0_21] : memref<1x32xf32, #tpu.memory_space<vmem>>, vector<1x32xf32>
    %19 = vector.broadcast %18 : vector<1x32xf32> to vector<8x32xf32>
    %20 = arith.addf %17, %19 : vector<8x32xf32>
    %21 = vector.extract_strided_slice %10 {offsets = [0, 0], sizes = [8, 8], strides = [1, 1]} : vector<8x32xf32> to vector<8x8xf32>
    %22 = vector.extract_strided_slice %10 {offsets = [0, 8], sizes = [8, 8], strides = [1, 1]} : vector<8x32xf32> to vector<8x8xf32>
    %23 = vector.extract_strided_slice %10 {offsets = [0, 16], sizes = [8, 8], strides = [1, 1]} : vector<8x32xf32> to vector<8x8xf32>
    %24 = vector.extract_strided_slice %10 {offsets = [0, 24], sizes = [8, 8], strides = [1, 1]} : vector<8x32xf32> to vector<8x8xf32>
    %25 = vector.shape_cast %21 : vector<8x8xf32> to vector<1x8x8xf32>
    %26 = vector.shape_cast %22 : vector<8x8xf32> to vector<1x8x8xf32>
    %27 = vector.shape_cast %23 : vector<8x8xf32> to vector<1x8x8xf32>
    %28 = vector.shape_cast %24 : vector<8x8xf32> to vector<1x8x8xf32>
    %29 = tpu.concatenate %25, %26, %27, %28 in 0 : vector<1x8x8xf32>, vector<1x8x8xf32>, vector<1x8x8xf32>, vector<1x8x8xf32> -> vector<4x8x8xf32>
    %30 = vector.extract_strided_slice %15 {offsets = [0, 0], sizes = [8, 8], strides = [1, 1]} : vector<8x32xf32> to vector<8x8xf32>
    %31 = vector.extract_strided_slice %15 {offsets = [0, 8], sizes = [8, 8], strides = [1, 1]} : vector<8x32xf32> to vector<8x8xf32>
    %32 = vector.extract_strided_slice %15 {offsets = [0, 16], sizes = [8, 8], strides = [1, 1]} : vector<8x32xf32> to vector<8x8xf32>
    %33 = vector.extract_strided_slice %15 {offsets = [0, 24], sizes = [8, 8], strides = [1, 1]} : vector<8x32xf32> to vector<8x8xf32>
    %34 = vector.shape_cast %30 : vector<8x8xf32> to vector<1x8x8xf32>
    %35 = vector.shape_cast %31 : vector<8x8xf32> to vector<1x8x8xf32>
    %36 = vector.shape_cast %32 : vector<8x8xf32> to vector<1x8x8xf32>
    %37 = vector.shape_cast %33 : vector<8x8xf32> to vector<1x8x8xf32>
    %38 = tpu.concatenate %34, %35, %36, %37 in 0 : vector<1x8x8xf32>, vector<1x8x8xf32>, vector<1x8x8xf32>, vector<1x8x8xf32> -> vector<4x8x8xf32>
    %39 = vector.extract_strided_slice %20 {offsets = [0, 0], sizes = [8, 8], strides = [1, 1]} : vector<8x32xf32> to vector<8x8xf32>
    %40 = vector.extract_strided_slice %20 {offsets = [0, 8], sizes = [8, 8], strides = [1, 1]} : vector<8x32xf32> to vector<8x8xf32>
    %41 = vector.extract_strided_slice %20 {offsets = [0, 16], sizes = [8, 8], strides = [1, 1]} : vector<8x32xf32> to vector<8x8xf32>
    %42 = vector.extract_strided_slice %20 {offsets = [0, 24], sizes = [8, 8], strides = [1, 1]} : vector<8x32xf32> to vector<8x8xf32>
    %43 = vector.shape_cast %39 : vector<8x8xf32> to vector<1x8x8xf32>
    %44 = vector.shape_cast %40 : vector<8x8xf32> to vector<1x8x8xf32>
    %45 = vector.shape_cast %41 : vector<8x8xf32> to vector<1x8x8xf32>
    %46 = vector.shape_cast %42 : vector<8x8xf32> to vector<1x8x8xf32>
    %47 = tpu.concatenate %43, %44, %45, %46 in 0 : vector<1x8x8xf32>, vector<1x8x8xf32>, vector<1x8x8xf32>, vector<1x8x8xf32> -> vector<4x8x8xf32>
    "tpu.trace_start"() <{level = 10 : i32, message = "hqd,hkd->hqk"}> : () -> ()
    %cst_22 = arith.constant dense<0.000000e+00> : vector<4x8x8xf32>
    %48 = tpu.matmul %29, %38, %cst_22 {dimension_numbers = #tpu.dot_dimension_numbers<[2], [2], [1], [1], [0, 0, 0, 1, 1, 1], [0], [0]>} : vector<4x8x8xf32>, vector<4x8x8xf32>, vector<4x8x8xf32> -> vector<4x8x8xf32>
    "tpu.trace_stop"() : () -> ()
    %cst_23 = arith.constant 0.353553385 : f32
    %49 = vector.broadcast %cst_23 : f32 to vector<4x8x8xf32>
    %50 = arith.mulf %48, %49 : vector<4x8x8xf32>
    %cst_24 = arith.constant dense<0xFF800000> : vector<4x8xf32>
    %51 = vector.multi_reduction <maximumf>, %50, %cst_24 [2] : vector<4x8x8xf32> to vector<4x8xf32>
    %52 = vector.shape_cast %51 : vector<4x8xf32> to vector<4x8x1xf32>
    %53 = vector.broadcast %52 : vector<4x8x1xf32> to vector<4x8x8xf32>
    %54 = arith.subf %50, %53 : vector<4x8x8xf32>
    %55 = math.exp %54 : vector<4x8x8xf32>
    %cst_25 = arith.constant dense<0.000000e+00> : vector<4x8xf32>
    %56 = vector.multi_reduction <add>, %55, %cst_25 [2] : vector<4x8x8xf32> to vector<4x8xf32>
    %57 = vector.shape_cast %56 : vector<4x8xf32> to vector<4x8x1xf32>
    %58 = vector.broadcast %57 : vector<4x8x1xf32> to vector<4x8x8xf32>
    %59 = arith.divf %55, %58 : vector<4x8x8xf32>
    "tpu.trace_start"() <{level = 10 : i32, message = "hqk,hkd->hqd"}> : () -> ()
    %cst_26 = arith.constant dense<0.000000e+00> : vector<4x8x8xf32>
    %60 = tpu.matmul %59, %47, %cst_26 {dimension_numbers = #tpu.dot_dimension_numbers<[2], [1], [1], [2], [0, 0, 0, 1, 1, 2], [0], [0]>} : vector<4x8x8xf32>, vector<4x8x8xf32>, vector<4x8x8xf32> -> vector<4x8x8xf32>
    "tpu.trace_stop"() : () -> ()
    %61 = vector.extract_strided_slice %60 {offsets = [0, 0, 0], sizes = [1, 8, 8], strides = [1, 1, 1]} : vector<4x8x8xf32> to vector<1x8x8xf32>
    %62 = vector.shape_cast %61 : vector<1x8x8xf32> to vector<8x8xf32>
    %63 = vector.extract_strided_slice %60 {offsets = [1, 0, 0], sizes = [1, 8, 8], strides = [1, 1, 1]} : vector<4x8x8xf32> to vector<1x8x8xf32>
    %64 = vector.shape_cast %63 : vector<1x8x8xf32> to vector<8x8xf32>
    %65 = vector.extract_strided_slice %60 {offsets = [2, 0, 0], sizes = [1, 8, 8], strides = [1, 1, 1]} : vector<4x8x8xf32> to vector<1x8x8xf32>
    %66 = vector.shape_cast %65 : vector<1x8x8xf32> to vector<8x8xf32>
    %67 = vector.extract_strided_slice %60 {offsets = [3, 0, 0], sizes = [1, 8, 8], strides = [1, 1, 1]} : vector<4x8x8xf32> to vector<1x8x8xf32>
    %68 = vector.shape_cast %67 : vector<1x8x8xf32> to vector<8x8xf32>
    %69 = tpu.concatenate %62, %64, %66, %68 in 1 : vector<8x8xf32>, vector<8x8xf32>, vector<8x8xf32>, vector<8x8xf32> -> vector<8x32xf32>
    %c0_27 = arith.constant 0 : index
    %c0_28 = arith.constant 0 : index
    %70 = vector.load %arg10[%c0_27, %c0_28] : memref<32x32xf32, #tpu.memory_space<vmem>>, vector<32x32xf32>
    %cst_29 = arith.constant dense<0.000000e+00> : vector<8x32xf32>
    %71 = tpu.matmul %69, %70, %cst_29 {dimension_numbers = #tpu.dot_dimension_numbers<[1], [0], [0], [1], [0, 0, 1, 1], [], []>} : vector<8x32xf32>, vector<32x32xf32>, vector<8x32xf32> -> vector<8x32xf32>
    %c0_30 = arith.constant 0 : index
    %c0_31 = arith.constant 0 : index
    %72 = vector.load %arg11[%c0_30, %c0_31] : memref<1x32xf32, #tpu.memory_space<vmem>>, vector<1x32xf32>
    %73 = vector.broadcast %72 : vector<1x32xf32> to vector<8x32xf32>
    %74 = arith.addf %71, %73 : vector<8x32xf32>
    %c0_32 = arith.constant 0 : index
    %c0_33 = arith.constant 0 : index
    %c0_34 = arith.constant 0 : index
    %75 = vector.load %arg12[%c0_32, %c0_33, %c0_34] : memref<1x8x32xf32, #tpu.memory_space<vmem>>, vector<1x8x32xf32>
    %76 = vector.shape_cast %75 : vector<1x8x32xf32> to vector<8x32xf32>
    %77 = vector.shape_cast %74 : vector<8x32xf32> to vector<1x8x32xf32>
    tpu.vector_store %arg12[%c0_32, %c0_33, %c0_34], %77 {strides = array<i32>} : memref<1x8x32xf32, #tpu.memory_space<vmem>>, vector<1x8x32xf32>,
    return
  }
  func.func @transform_0(%arg0: i32) -> (i32, i32, i32) {
    %c0_i32 = arith.constant 0 : i32
    %c0_i32_0 = arith.constant 0 : i32
    %c0_i32_1 = arith.constant 0 : i32
    return %arg0, %c0_i32, %c0_i32_0 : i32, i32, i32
  }
  func.func @transform_1(%arg0: i32) -> (i32, i32, i32) {
    %c0_i32 = arith.constant 0 : i32
    %c0_i32_0 = arith.constant 0 : i32
    %c0_i32_1 = arith.constant 0 : i32
    return %arg0, %c0_i32, %c0_i32_0 : i32, i32, i32
  }
  func.func @transform_2(%arg0: i32) -> (i32, i32, i32) {
    %c0_i32 = arith.constant 0 : i32
    %c0_i32_0 = arith.constant 0 : i32
    %c0_i32_1 = arith.constant 0 : i32
    return %arg0, %c0_i32, %c0_i32_0 : i32, i32, i32
  }
  func.func @transform_3(%arg0: i32) -> (i32, i32) {
    %c0_i32 = arith.constant 0 : i32
    %c0_i32_0 = arith.constant 0 : i32
    %c0_i32_1 = arith.constant 0 : i32
    return %c0_i32, %c0_i32_0 : i32, i32
  }
  func.func @transform_4(%arg0: i32) -> (i32, i32) {
    %c0_i32 = arith.constant 0 : i32
    %c0_i32_0 = arith.constant 0 : i32
    %c0_i32_1 = arith.constant 0 : i32
    return %c0_i32, %c0_i32_0 : i32, i32
  }
  func.func @transform_5(%arg0: i32) -> (i32, i32) {
    %c0_i32 = arith.constant 0 : i32
    %c0_i32_0 = arith.constant 0 : i32
    %c0_i32_1 = arith.constant 0 : i32
    return %c0_i32, %c0_i32_0 : i32, i32
  }
  func.func @transform_6(%arg0: i32) -> (i32, i32) {
    %c0_i32 = arith.constant 0 : i32
    %c0_i32_0 = arith.constant 0 : i32
    %c0_i32_1 = arith.constant 0 : i32
    return %c0_i32, %c0_i32_0 : i32, i32
  }
  func.func @transform_7(%arg0: i32) -> (i32, i32) {
    %c0_i32 = arith.constant 0 : i32
    %c0_i32_0 = arith.constant 0 : i32
    %c0_i32_1 = arith.constant 0 : i32
    return %c0_i32, %c0_i32_0 : i32, i32
  }
  func.func @transform_8(%arg0: i32) -> (i32, i32) {
    %c0_i32 = arith.constant 0 : i32
    %c0_i32_0 = arith.constant 0 : i32
    %c0_i32_1 = arith.constant 0 : i32
    return %c0_i32, %c0_i32_0 : i32, i32
  }
  func.func @transform_9(%arg0: i32) -> (i32, i32) {
    %c0_i32 = arith.constant 0 : i32
    %c0_i32_0 = arith.constant 0 : i32
    %c0_i32_1 = arith.constant 0 : i32
    return %c0_i32, %c0_i32_0 : i32, i32
  }
  func.func @transform_10(%arg0: i32) -> (i32, i32) {
    %c0_i32 = arith.constant 0 : i32
    %c0_i32_0 = arith.constant 0 : i32
    %c0_i32_1 = arith.constant 0 : i32
    return %c0_i32, %c0_i32_0 : i32, i32
  }
  func.func @transform_11(%arg0: i32) -> (i32, i32, i32) {
    %c0_i32 = arith.constant 0 : i32
    %c0_i32_0 = arith.constant 0 : i32
    %c0_i32_1 = arith.constant 0 : i32
    return %arg0, %c0_i32, %c0_i32_0 : i32, i32, i32
  }
}

</mosaic_0001>

<bundles_post_ra>
// kernel: tpu_custom_call.1
= control target key start
LH: loop header
LB: loop body
LE: loop exit
PB: predicated region body
PF: predicated region fallthrough
CT: control target
= control target key end

     0   :  { %s2845_s0 = inlined_call_operand.hbm [shape: f32[2,8,32], index: 0, kind: input, shape index: {}]   ;;  %s2846_s1 = inlined_call_operand.hbm [shape: f32[2,8,32], index: 1, kind: input, shape index: {}]   ;;  %s2847_s2 = inlined_call_operand.hbm [shape: f32[2,8,32], index: 2, kind: input, shape index: {}]   ;;  %s2848_s3 = inlined_call_operand.hbm [shape: f32[32,32], index: 3, kind: input, shape index: {}]   ;;  %s2849_s4 = inlined_call_operand.hbm [shape: f32[32,32], index: 4, kind: input, shape index: {}]   ;;  %s2850_s5 = inlined_call_operand.hbm [shape: f32[32,32], index: 5, kind: input, shape index: {}]   ;;  %s2851_s6 = inlined_call_operand.vmem [shape: f32[1,32], index: 6, kind: input, shape index: {}]   ;;  %s2852_s7 = inlined_call_operand.vmem [shape: f32[1,32], index: 7, kind: input, shape index: {}]   ;;  %s2853_s8 = inlined_call_operand.hbm [shape: f32[1,32], index: 8, kind: input, shape index: {}]   ;;  %s2854_s9 = inlined_call_operand.vmem [shape: f32[32,32], index: 9, kind: input, shape index: {}]   ;;  %s2855_s10 = inlined_call_operand.vmem [shape: f32[1,32], index: 10, kind: input, shape index: {}]   ;;  %s2856_s11 = inlined_call_operand.hbm [shape: f32[2,8,32], index: 11, kind: output, shape index: {}]  }
   0x1   :  { %2881 = sst [smem:[#allocation26_spill]] %s2846_s1 }
   0x2   :  { %2882 = sst [smem:[#allocation27_spill]] %s2848_s3 }
   0x3   :  { %2883 = sst [smem:[#allocation28_spill]] %s2850_s5 }
   0x4   :  { %2884 = sst [smem:[#allocation29_spill]] %s2851_s6 }
   0x5   :  { %2885 = sst [smem:[#allocation30_spill]] %s2854_s9 }
   0x6   :  { %2886 = sst [smem:[#allocation31_spill]] %s2855_s10 }
   0x7   :  { %2887 = sst [smem:[#allocation32_spill]] %s2856_s11 }
   0x8   :  { %16 = vsyncpa [#allocation3], 0 }
   0x9   :  { %18 = vsyncpa [#allocation3 + $0x1], 0 }
   0xa   :  { %19 = vsyncpa [#allocation6], 0 }
   0xb   :  { %21 = vsyncpa [#allocation6 + $0x1], 0 }
   0xc   :  { %22 = vsyncpa [#allocation9], 0 }
   0xd   :  { %23 = vsyncpa [#allocation12], 0 }
   0xe   :  { %24 = vsyncpa [#allocation4], 0 }
   0xf   :  { %26 = vsyncpa [#allocation4 + $0x1], 0  ;;  %s2388_s17 = smov 0   ;;  %s2390_s18 = smov 0  }
  0x10   :  { %s2392_s19 = smov 0   ;;  %s2394_s20 = smov 0  }
  0x11 LB: > { %2888 = sst [smem:[#allocation20_spill]] %s2295_s17  ;;  %s2309_s21 = smov [#allocation8]   ;;  %s2307_s20 = sphi %s2394_s20, %s2930_s20   ;;  %s2303_s19 = sphi %s2392_s19, %s2934_s19   ;;  %s2299_s18 = sphi %s2390_s18, %s2933_s18   ;;  %s2295_s17 = sphi %s2388_s17, %s2932_s17  }
  0x12   : > { %2889 = sst [smem:[#allocation21_spill]] %s2307_s20  ;;  %s321_s22 = sshll.u32 %s2309_s21, 4  ;;  %s2414_s22 = int_to_ptr.vmem [resolvable:$true] %s321_s22 }
  0x13   : > { %s2409_s23 = sadd.s32 4294967295, %s2307_s20   ;;  %p1714_p0 = scmp.ge.s32.totalorder %s2307_s20, 1 }
  0x14   : > { %p2867_p1 = scmp.eq.s32.totalorder %s2409_s23, 0  ;;  %p309_p2 = scmp.lt.s32.totalorder %s2307_s20, 3 }
  0x15   : > { %s2310_s25 = smov [#allocation11]   ;;  %s2892_s3 = sld [smem:[#allocation27_spill]] }
  0x16   : > { %p2416_p3 = pnand %p1714_p0, %p309_p2  ;;  %s347_s26 = sshll.u32 %s2310_s25, 4  ;;  %s2429_s26 = int_to_ptr.vmem [resolvable:$true] %s347_s26 }
  0x18   : > { %s2890_s24 = scalar_select %p2416_p3, 1, 0 }
  0x19   : > { %p1927_p5 = pneg %p2416_p3 }
  0x1b   : > { %p2425_p6 = pnand %p1927_p5, %p2867_p1  ;;  %s2027_s30 = scalar_lea.hbm %s2892_s3, 512 }
  0x1c   : > { %p2028_p7 = scmp.ne.s32.totalorder %s2892_s3, %s2027_s30  ;;  %p2034_p11 = scmp.lt.u32.totalorder %s2027_s30, %s2892_s3 }
  0x1d   : > { %s2891_s27 = scalar_select %p2425_p6, 1, 0 }
  0x1e   : > { %p2439_p8 = pneg %p2425_p6 }
  0x20   : > { %s2893_s14 = scalar_select %p2439_p8, 1, 0 }
  0x21   : > { %p2030_p9 = pnand %p2439_p8, %p2028_p7 }
  0x23   : > { %p2031_p10 = pneg %p2030_p9 }
  0x25   : > { %p2036_p12 = pnand %p2034_p11, %p2031_p10 }
  0x27   : > { %2039 = shalt.err (!%p2036_p12)
}
  0x28   : > { %s2040_s21 = scalar_lea.vmem %s2414_s22, 512  ;;  %p2048_p5 = scmp.lt.s32.totalorder %s2414_s22, %s2414_s22 }
  0x29   : > { %p2041_p13 = scmp.ne.s32.totalorder %s2414_s22, %s2040_s21  ;;  %p2049_p4 = scmp.lt.s32.totalorder %s2040_s21, %s2040_s21 }
  0x2b   : > { %p2043_p0 = pnand %p2041_p13, %p2439_p8  ;;  %p2050_p7 = por %p2049_p4, %p2048_p5 }
  0x2d   : > { %p2044_p2 = pneg %p2043_p0 }
  0x2f   : > { %p2051_p9 = pnand %p2050_p7, %p2044_p2 }
  0x31   : > { %2054 = shalt.err (!%p2051_p9)
}
  0x32   : > { %s2859_s25 = smov 128   ;;  %s2860_s28 = smov 8  }
  0x33   : > { %1930 = dma.hbm_to_vmem [thread:$0]  (!%p2425_p6), %s2892_s3, 512, %s2414_s22, [#allocation9], %s2859_s25, %s2859_s25, %s2860_s28  }
  0x34   : > { %s2894_s5 = sld [smem:[#allocation28_spill]] }
  0x3a   : > { %s2055_s15 = scalar_lea.hbm %s2894_s5, 512 }
  0x3b   : > { %p2056_p4 = scmp.ne.s32.totalorder %s2894_s5, %s2055_s15  ;;  %p2062_p12 = scmp.lt.u32.totalorder %s2055_s15, %s2894_s5 }
  0x3d   : > { %p2058_p10 = pnand %p2056_p4, %p2439_p8 }
  0x3f   : > { %p2059_p11 = pneg %p2058_p10 }
  0x41   : > { %p2064_p13 = pnand %p2062_p12, %p2059_p11 }
  0x43   : > { %2067 = shalt.err (!%p2064_p13)
}
  0x44   : > { %s2068_s22 = scalar_lea.vmem %s2429_s26, 512  ;;  %p2076_p7 = scmp.lt.s32.totalorder %s2429_s26, %s2429_s26 }
  0x45   : > { %p2069_p0 = scmp.ne.s32.totalorder %s2429_s26, %s2068_s22  ;;  %p2077_p9 = scmp.lt.s32.totalorder %s2068_s22, %s2068_s22 }
  0x47   : > { %p2071_p2 = pnand %p2069_p0, %p2439_p8  ;;  %p2078_p4 = por %p2077_p9, %p2076_p7 }
  0x49   : > { %p2072_p5 = pneg %p2071_p2 }
  0x4b   : > { %p2079_p10 = pnand %p2078_p4, %p2072_p5 }
  0x4d   : > { %2082 = shalt.err (!%p2079_p10)
}
  0x4e   : > { %1936 = dma.hbm_to_vmem [thread:$0]  (!%p2425_p6), %s2894_s5, 512, %s2429_s26, [#allocation12], %s2859_s25, %s2859_s25, %s2860_s28  }
  0x4f   : > { %s1713_s29 = sadd.s32 4294967294, %s2307_s20   ;;  %s2491_s30 = sadd.s32 1, %s2307_s20  }
  0x50   : > { %2895 = sst [smem:[#allocation22_spill]] %s2491_s30  ;;  %s36_s12 = ssub.s32 %s2307_s20, %s2491_s30 }
  0x51   : > { %s39_s13 = sadd.s32 1, %s2303_s19  ;;  %p37_p11 = scmp.eq.s32.totalorder %s36_s12, 0 }
  0x52   : > { %p46_p12 = scmp.ne.s32.totalorder %s2303_s19, %s2299_s18  ;;  %p47_p13 = scmp.eq.s32.totalorder %s2307_s20, 0 }
  0x53   : > { %p52_p0 = scmp.ne.s32.totalorder %s2299_s18, %s2295_s17  ;;  %p296_p7 = scmp.eq.s32.totalorder %s2409_s23, 1 }
  0x54   : > { %s2502_s15 = scalar_select %p37_p11, %s2303_s19, %s39_s13  }
  0x55   : > { %p48_p2 = por %p47_p13, %p46_p12  ;;  %p2506_p5 = por %p2867_p1, %p52_p0 }
  0x56   : > { %2896 = sst [smem:[#allocation23_spill]] %s2502_s15  ;;  %p302_p9 = scmp.eq.s32.totalorder %s1713_s29, 1 }
  0x57   : > { %s2897_s16 = scalar_select %p2506_p5, 1, 0 }
  0x58   : > { %p1958_p4 = scmp.lt.s32.totalorder %s2307_s20, 2  ;;  %s2861_s26 = sand.u32 1, %s2303_s19  }
  0x59   : > { %p2513_p10 = por %p296_p7, %p46_p12  ;;  %p2517_p3 = por %p302_p9, %p52_p0 }
  0x5a   : > { %s2523_s10 = sshll.u32 %s2861_s26, 3  ;;  %s2526_s11 = sshll.u32 %s2307_s20, 7 }
  0x5b   : > { %s2898_s21 = scalar_select %p2513_p10, 1, 0 }
  0x5c   : > { %s2900_s22 = scalar_select %p2517_p3, 1, 0 }
  0x5d   : > { %2899 = sst [smem:[#allocation24_spill]] %s2898_s21  ;;  %p2528_p11 = pnand %p1958_p4, %p48_p2 }
  0x5e   : > { %2901 = sst [smem:[#allocation25_spill]] %s2900_s22  ;;  %s402_s29 = sand.u32 1, %s2307_s20  }
  0x5f   : > { %s2902_s12 = scalar_select %p2528_p11, 1, 0 }
  0x60   : > { %s2903_s1 = sld [smem:[#allocation26_spill]]  ;;  %s406_s26 = scalar_lea.vmem [#allocation5], %s2523_s10 }
  0x61   : > { %s413_s3 = sshll.u32 %s406_s26, 4  ;;  %s2313_s5 = smov [#allocation10]   ;;  %s2540_s3 = int_to_ptr.vmem [resolvable:$true] %s413_s3 }
  0x62   : > { %s2542_s15 = sshll.u32 %s2313_s5, 4  ;;  %s2544_s30 = scalar_lea.sflag [#allocation6], %s402_s29  ;;  %s335_s15 = int_to_ptr.vmem [resolvable:$true] %s2542_s15 }
  0x63   : > { %p2550_p13 = pneg %p2528_p11 }
  0x65   : > { %s2904_s25 = scalar_select %p2550_p13, 1, 0 }
  0x66   : > { %s2537_s28 = scalar_lea.hbm %s2903_s1, %s2526_s11  ;;  %s2088_s20 = scalar_lea.hbm %s2903_s1, 256 }
  0x67   : > { %s2083_s22 = scalar_lea.hbm %s2537_s28, 128  ;;  %p2089_p7 = scmp.lt.u32.totalorder %s2537_s28, %s2903_s1 }
  0x68   : > { %p2084_p12 = scmp.ne.s32.totalorder %s2537_s28, %s2083_s22  ;;  %p2090_p9 = scmp.lt.u32.totalorder %s2088_s20, %s2083_s22 }
  0x69   : > { %p2092_p1 = scmp.lt.u32.totalorder %s2083_s22, %s2537_s28 }
  0x6a   : > { %p2086_p0 = pnand %p2550_p13, %p2084_p12  ;;  %p2091_p4 = por %p2090_p9, %p2089_p7 }
  0x6c   : > { %p2087_p2 = pneg %p2086_p0  ;;  %p2093_p3 = por %p2092_p1, %p2091_p4 }
  0x6e   : > { %p2094_p10 = pnand %p2093_p3, %p2087_p2 }
  0x70   : > { %2097 = shalt.err (!%p2094_p10)
}
  0x71   : > { %s2098_s29 = scalar_lea.vmem %s2540_s3, 128  ;;  %s2314_s13 = smov [#allocation5]  }
  0x72   : > { %p2099_p12 = scmp.ne.s32.totalorder %s2540_s3, %s2098_s29  ;;  %s2103_s26 = sshll.u32 %s2314_s13, 4  ;;  %s2104_s26 = int_to_ptr.vmem [resolvable:$false] %s2103_s26 }
  0x73   : > { %s2105_s17 = scalar_lea.vmem %s2104_s26, 256  ;;  %p2106_p6 = scmp.lt.s32.totalorder %s2540_s3, %s2104_s26 }
  0x74   : > { %p2101_p0 = pnand %p2099_p12, %p2550_p13  ;;  %p2107_p8 = scmp.lt.s32.totalorder %s2105_s17, %s2098_s29 }
  0x76   : > { %p2102_p5 = pneg %p2101_p0  ;;  %p2108_p7 = por %p2107_p8, %p2106_p6 }
  0x78   : > { %p2109_p9 = pnand %p2108_p7, %p2102_p5 }
  0x7a   : > { %2112 = shalt.err (!%p2109_p9)
}
  0x7b   : > { %1946 = dma.hbm_to_vmem [thread:$0]  (!%p2528_p11), %s2537_s28, 128, %s2540_s3, %s2544_s30  }
  0x7c   : > { %s2113_s5 = scalar_lea.hbm %s2849_s4, 512  ;;  %p2905_p3 = scmp.ne.s32.totalorder %s2893_s14, 0 }
  0x7d   : > { %p2114_p1 = scmp.ne.s32.totalorder %s2849_s4, %s2113_s5  ;;  %p2120_p5 = scmp.lt.u32.totalorder %s2113_s5, %s2849_s4 }
  0x7f   : > { %p2116_p6 = pnand %p2114_p1, %p2905_p3 }
  0x81   : > { %p2117_p8 = pneg %p2116_p6 }
  0x83   : > { %p2122_p10 = pnand %p2120_p5, %p2117_p8 }
  0x85   : > { %2125 = shalt.err (!%p2122_p10)
}
  0x86   : > { %s2126_s17 = scalar_lea.vmem %s335_s15, 512  ;;  %p2134_p0 = scmp.lt.s32.totalorder %s335_s15, %s335_s15 }
  0x87   : > { %p2127_p2 = scmp.ne.s32.totalorder %s335_s15, %s2126_s17  ;;  %p2135_p7 = scmp.lt.s32.totalorder %s2126_s17, %s2126_s17 }
  0x89   : > { %p2129_p4 = pnand %p2127_p2, %p2905_p3  ;;  %p2136_p9 = por %p2135_p7, %p2134_p0 }
  0x8b   : > { %p2130_p12 = pneg %p2129_p4 }
  0x8d   : > { %p2137_p11 = pnand %p2136_p9, %p2130_p12 }
  0x8f   : > { %2140 = shalt.err (!%p2137_p11)
}
  0x90   : > { %p2906_p1 = scmp.ne.s32.totalorder %s2891_s27, 0  ;;  %s2907_s1 = smov 8  }
  0x91   : > { %s2908_s3 = smov 128   ;;  %s2315_s22 = smov [#allocation13]  }
  0x92   : > { %1933 = dma.hbm_to_vmem [thread:$0]  (!%p2906_p1), %s2849_s4, 512, %s335_s15, [#allocation9], %s2908_s3, %s2908_s3, %s2907_s1  }
  0x93   : > { %s367_s5 = sshll.u32 %s2315_s22, 4  ;;  %s2141_s26 = scalar_lea.hbm %s2853_s8, 16  ;;  %s368_s5 = int_to_ptr.vmem [resolvable:$true] %s367_s5 }
  0x94   : > { %p2142_p11 = scmp.ne.s32.totalorder %s2853_s8, %s2141_s26  ;;  %p2148_p5 = scmp.lt.u32.totalorder %s2141_s26, %s2853_s8 }
  0x96   : > { %p2144_p6 = pnand %p2142_p11, %p2905_p3 }
  0x98   : > { %p2145_p8 = pneg %p2144_p6 }
  0x9a   : > { %p2150_p10 = pnand %p2148_p5, %p2145_p8 }
  0x9c   : > { %2153 = shalt.err (!%p2150_p10)
}
  0x9d   : > { %s2154_s15 = scalar_lea.vmem %s368_s5, 16  ;;  %s2161_s1 = scalar_lea.vmem %s368_s5, 32 }
  0x9e   : > { %p2155_p2 = scmp.ne.s32.totalorder %s368_s5, %s2154_s15  ;;  %p2162_p0 = scmp.lt.s32.totalorder %s368_s5, %s368_s5 }
  0x9f   : > { %p2163_p7 = scmp.lt.s32.totalorder %s2161_s1, %s2154_s15 }
  0xa0   : > { %p2157_p4 = pnand %p2155_p2, %p2905_p3 }
  0xa1   : > { %p2164_p9 = por %p2163_p7, %p2162_p0 }
  0xa2   : > { %p2158_p12 = pneg %p2157_p4 }
  0xa4   : > { %p2165_p13 = pnand %p2164_p9, %p2158_p12 }
  0xa6   : > { %2168 = shalt.err (!%p2165_p13)
}
  0xa7   : > { %1939 = dma.hbm_to_vmem [thread:$0]  (!%p2906_p1), %s2853_s8, 16, %s368_s5, [#allocation12]  }
  0xa8   : > { %s2618_s14 = scalar_lea.hbm %s2845_s0, %s2526_s11  ;;  %s388_s28 = scalar_lea.vmem [#allocation2], %s2523_s10 }
  0xa9   : > { %s395_s20 = sshll.u32 %s388_s28, 4  ;;  %s2909_s27 = sand.u32 1, %s2303_s19   ;;  %s396_s20 = int_to_ptr.vmem [resolvable:$true] %s395_s20 }
  0xaa   : > { %s385_s22 = scalar_lea.sflag [#allocation3], %s2909_s27  ;;  %s2169_s13 = scalar_lea.hbm %s2618_s14, 128 }
  0xab   : > { %p2170_p13 = scmp.ne.s32.totalorder %s2618_s14, %s2169_s13  ;;  %p2910_p3 = scmp.ne.s32.totalorder %s2904_s25, 0 }
  0xac   : > { %s2174_s26 = scalar_lea.hbm %s2845_s0, 256  ;;  %p2175_p1 = scmp.lt.u32.totalorder %s2618_s14, %s2845_s0 }
  0xad   : > { %p2172_p11 = pnand %p2170_p13, %p2910_p3  ;;  %p2176_p8 = scmp.lt.u32.totalorder %s2174_s26, %s2169_s13 }
  0xae   : > { %p2178_p10 = scmp.lt.u32.totalorder %s2169_s13, %s2618_s14 }
  0xaf   : > { %p2173_p6 = pneg %p2172_p11  ;;  %p2177_p5 = por %p2176_p8, %p2175_p1 }
  0xb1   : > { %p2179_p2 = por %p2178_p10, %p2177_p5 }
  0xb3   : > { %p2180_p4 = pnand %p2179_p2, %p2173_p6 }
  0xb5   : > { %2183 = shalt.err (!%p2180_p4)
}
  0xb6   : > { %s2184_s1 = scalar_lea.vmem %s396_s20, 128  ;;  %s2316_s21 = smov [#allocation2]  }
  0xb7   : > { %p2185_p12 = scmp.ne.s32.totalorder %s396_s20, %s2184_s1  ;;  %s2189_s3 = sshll.u32 %s2316_s21, 4  ;;  %s2190_s3 = int_to_ptr.vmem [resolvable:$false] %s2189_s3 }
  0xb8   : > { %s2191_s6 = scalar_lea.vmem %s2190_s3, 256  ;;  %p2192_p9 = scmp.lt.s32.totalorder %s396_s20, %s2190_s3 }
  0xb9   : > { %p2187_p0 = pnand %p2185_p12, %p2910_p3  ;;  %p2193_p13 = scmp.lt.s32.totalorder %s2191_s6, %s2184_s1 }
  0xbb   : > { %p2188_p7 = pneg %p2187_p0  ;;  %p2194_p11 = por %p2193_p13, %p2192_p9 }
  0xbd   : > { %p2195_p1 = pnand %p2194_p11, %p2188_p7 }
  0xbf   : > { %2198 = shalt.err (!%p2195_p1)
}
  0xc0   : > { %p2911_p8 = scmp.ne.s32.totalorder %s2902_s12, 0  ;;  %s2644_s27 = scalar_lea.hbm %s2847_s2, %s2526_s11 }
  0xc1   : > { %s424_s13 = scalar_lea.vmem [#allocation7], %s2523_s10  ;;  %s2199_s29 = scalar_lea.hbm %s2644_s27, 128 }
  0xc2   : > { %1943 = dma.hbm_to_vmem [thread:$0]  (!%p2911_p8), %s2618_s14, 128, %s396_s20, %s385_s22  }
  0xc3   : > { %s431_s5 = sshll.u32 %s424_s13, 4  ;;  %p2200_p6 = scmp.ne.s32.totalorder %s2644_s27, %s2199_s29  ;;  %s432_s5 = int_to_ptr.vmem [resolvable:$true] %s431_s5 }
  0xc4   : > { %s2204_s14 = scalar_lea.hbm %s2847_s2, 256  ;;  %p2205_p2 = scmp.lt.u32.totalorder %s2644_s27, %s2847_s2 }
  0xc5   : > { %p2202_p5 = pnand %p2200_p6, %p2910_p3  ;;  %p2206_p4 = scmp.lt.u32.totalorder %s2204_s14, %s2199_s29 }
  0xc6   : > { %p2208_p0 = scmp.lt.u32.totalorder %s2199_s29, %s2644_s27 }
  0xc7   : > { %p2203_p10 = pneg %p2202_p5  ;;  %p2207_p12 = por %p2206_p4, %p2205_p2 }
  0xc9   : > { %p2209_p7 = por %p2208_p0, %p2207_p12 }
  0xcb   : > { %p2210_p9 = pnand %p2209_p7, %p2203_p10 }
  0xcd   : > { %2213 = shalt.err (!%p2210_p9)
}
  0xce   : > { %s2214_s10 = scalar_lea.vmem %s432_s5, 128  ;;  %s2317_s11 = smov [#allocation7]  }
  0xcf   : > { %p2215_p13 = scmp.ne.s32.totalorder %s432_s5, %s2214_s10  ;;  %s2219_s15 = sshll.u32 %s2317_s11, 4  ;;  %s2220_s15 = int_to_ptr.vmem [resolvable:$false] %s2219_s15 }
  0xd0   : > { %s2221_s1 = scalar_lea.vmem %s2220_s15, 256  ;;  %p2222_p6 = scmp.lt.s32.totalorder %s432_s5, %s2220_s15 }
  0xd1   : > { %p2217_p11 = pnand %p2215_p13, %p2910_p3  ;;  %p2223_p5 = scmp.lt.s32.totalorder %s2221_s1, %s2214_s10 }
  0xd3   : > { %p2218_p1 = pneg %p2217_p11  ;;  %p2224_p8 = por %p2223_p5, %p2222_p6 }
  0xd5   : > { %p2225_p2 = pnand %p2224_p8, %p2218_p1 }
  0xd7   : > { %2228 = shalt.err (!%p2225_p2)
}
  0xd8   : > { %p2912_p4 = scmp.ne.s32.totalorder %s2902_s12, 0  ;;  %p2913_p10 = scmp.ne.s32.totalorder %s2890_s24, 0 }
  0xd9   : > { %s2668_s25 = sand.u32 (!%p2913_p10), 1, %s2299_s18   ;;  %p2914_p3 = scmp.ne.s32.totalorder (!%p2913_p10), %s2897_s16, 0 }
  0xda   : > { %1949 = dma.hbm_to_vmem [thread:$0]  (!%p2912_p4), %s2644_s27, 128, %s432_s5, %s2544_s30  }
  0xdb   : > { %440 = sbr.rel (%p2913_p10) target bundleno = 1672 (0x688), region = 64  ;;  %s2671_s21 = sshll.u32 (!%p2913_p10), %s2668_s25, 3 }
  0xdc   : > { %s443_s3 = scalar_lea.sflag (!%p2913_p10), [#allocation3], %s2668_s25  ;;  %s446_s6 = scalar_lea.vmem (!%p2913_p10), [#allocation2], %s2671_s21 }
  0xe2   : > { %2274 = dma.done.wait (%p2914_p3), %s443_s3, 128  }
  0xe3   : > { %2276 = vsyncadd (%p2914_p3), %s443_s3, 4294967168  ;;  %s451_s24 = sand.u32 1, %s2409_s23   ;;  %s455_s12 = scalar_lea.vmem [#allocation5], %s2671_s21 }
  0xe4   : > { %s452_s30 = scalar_lea.sflag [#allocation6], %s451_s24 }
  0xe5   : > { %2278 = dma.done.wait (%p2914_p3), %s452_s30, 256  }
  0xe6   : > { %2280 = vsyncadd (%p2914_p3), %s452_s30, 4294967040  ;;  %s464_s9 = scalar_lea.vmem [#allocation7], %s2671_s21  ;;  %p2915_p8 = scmp.eq.s32.totalorder %s2409_s23, 0 }
  0xe8   : > { %2282 = dma.done.wait (%p2915_p8), [#allocation9], 1024   ;;  %p2916_p12 = pmov %p2915_p8 }
  0xe9   : > { %p2917_p0 = pmov %p2915_p8 }
  0xea   : > { %2284 = vsyncadd (%p2916_p12), [#allocation9], 4294966272 }
  0xeb   : > { %2286 = dma.done.wait (%p2917_p0), [#allocation12], 528   ;;  %p2918_p7 = pmov %p2917_p0 }
  0xec   : > { %v2318_v0 = vmov 0.0|0.0   ;;  %vm2319_vm0 = vmmov 0   ;;  %v2320_v1 = vmov 0.0   ;;  %v617_v2 = vld [vmem:[#allocation10] sm:$0xff]  ;;  %v618_v3 = vld [vmem:[#allocation10 + $0x8] sm:$0xff]  ;;  %v619_v7 = vld [vmem:[#allocation10 + $0x10] sm:$0xff] }
  0xed   : > { %2288 = vsyncadd (%p2918_p7), [#allocation12], 4294966768  ;;  %1885 = vmatprep.subr.bf16.mxu1 %v2318_v0  ;;  %1879 = vmatprep.subr.bf16.mxu0 %v2318_v0  ;;  %v532_v4 = vld [vmem:[#allocation8] sm:$0xff]  ;;  %v1886_v5 = vpack.c.bf16 %v618_v3, %v617_v2  ;;  %v533_v6 = vld [vmem:[#allocation8 + $0x8] sm:$0xff]  ;;  %vm543_vm1 = vcmask 261120   ;;  %s2919_s5 = sld [smem:[#allocation29_spill]] }
  0xee   : > { %1814 = vmatprep.mubr.msk.f32.mxu1 %vm2319_vm0, %v2320_v1  ;;  %1803 = vmatprep.mubr.msk.f32.mxu0 %vm2319_vm0, %v2320_v1  ;;  %v620_v8 = vld [vmem:[#allocation10 + $0x18] sm:$0xff]  ;;  %v1880_v9 = vpack.c.bf16 %v533_v6, %v532_v4  ;;  %v534_v10 = vld [vmem:[#allocation8 + $0x10] sm:$0xff]  ;;  %v530_v14 = vld [vmem:[%s455_s12] sm:$0xff]  ;;  %vm809_vm2 = vcmask 64512   ;;  %s2321_s29 = smov 112   ;;  %s2322_s26 = smov 120  }
  0xef   : > { %v535_v11 = vld [vmem:[#allocation8 + $0x18] sm:$0xff]  ;;  %1887 = vmatpush3.bf16.msra.mxu1 %v1886_v5  ;;  %v1889_v12 = vpack.c.bf16 %v620_v8, %v619_v7  ;;  %v1737_v16 = vld [vmem:[%s2852_s7] ss:$0 sm:$0xff]  ;;  %v701_v24 = vld [vmem:[#allocation11] sm:$0xff]  ;;  %s2323_s17 = smov 104   ;;  %s2920_s22 = sld [smem:[#allocation30_spill]] }
  0xf0   : > { %1881 = vmatpush3.bf16.msra.mxu0 %v1880_v9  ;;  %1888 = vmatprep.subr.bf16.mxu1 %v2318_v0  ;;  %v1883_v13 = vpack.c.bf16 %v535_v11, %v534_v10  ;;  %v529_v15 = vld [vmem:[%s446_s6] sm:$0xff]  ;;  %v702_v25 = vld [vmem:[#allocation11 + $0x8] sm:$0xff]  ;;  %v1739_v41 = vld [vmem:[#allocation13] ss:$0 sm:$0xff]  ;;  %s2324_s24 = smov 8   ;;  %s2325_s30 = smov 16  }
  0xf1   : > { %1882 = vmatprep.subr.bf16.mxu0 %v2318_v0  ;;  %v703_v26 = vld [vmem:[#allocation11 + $0x10] sm:$0xff]  ;;  %v1892_v27 = vpack.c.bf16 %v702_v25, %v701_v24  ;;  %v704_v28 = vld [vmem:[#allocation11 + $0x18] sm:$0xff]  ;;  %s2326_s12 = smov 24   ;;  %vm1459_vm3 = vcmask 130048   ;;  %vm1461_vm4 = vcmask 195584   ;;  %s2922_s27 = sld [smem:[#allocation31_spill]] }
  0xf2   : > { %v1895_v29 = vpack.c.bf16 %v704_v28, %v703_v26  ;;  %v531_v30 = vld [vmem:[%s464_s9] sm:$0xff]  ;;  %s2921_s9 = sld [smem:[#allocation24_spill]]  ;;  %s1756_s13 = sshll.u32 %s2409_s23, 7 }
  0xf3   : > { %1890 = vmatpush3.bf16.msra.mxu1 %v1889_v12  ;;  %v1735_v18 = vld [vmem:[%s2919_s5] ss:$0 sm:$0xff]  ;;  %s528_s5 = scalar_lea.vmem [#allocation14], %s2671_s21  ;;  %s2923_s14 = sld [smem:[#allocation32_spill]] }
  0xf4   : > { %1884 = vmatpush3.bf16.msra.mxu0 %v1883_v13  ;;  %1828 = vmatprep.subr.mxu1 %v2320_v1  ;;  %s1549_s10 = scalar_lea.sflag [#allocation4], %s2668_s25  ;;  %s2327_s23 = smov [#allocation14]  }
  0xf5   : > { %1891 = vmatprep.subr.bf16.mxu0 %v2318_v0  ;;  %s2233_s21 = sshll.u32 %s2327_s23, 4  ;;  %s2234_s21 = int_to_ptr.vmem [resolvable:$false] %s2233_s21 }
  0xf6   : > { %1815 = vmatmul.mubr.msk.f32.vlgmr.msra.gmra.mrb[0].mxu1 %vm543_vm1, %v530_v14  ;;  %s2235_s15 = scalar_lea.vmem %s2234_s21, 256 }
  0xf7   : > { %1804 = vmatmul.mubr.msk.f32.vlgmr.msra.gmra.mrb[0].mxu0 %vm543_vm1, %v529_v15  ;;  %1830 = vmatprep.mubr.msk.f32.mxu1 %vm2319_vm0, %v2320_v1 }
  0xf8   : > { %1825 = vmatprep.mubr.msk.f32.mxu0 %vm2319_vm0, %v2320_v1  ;;  %1893 = vmatpush3.bf16.msra.mxu0 %v1892_v27  ;;  %p2924_p13 = scmp.ne.s32.totalorder %s2921_s9, 0 }
  0xf9   : > { %1894 = vmatprep.subr.bf16.mxu0 %v2318_v0  ;;  %s2800_s20 = scalar_lea.hbm %s2923_s14, %s1756_s13 }
  0xfc   : > { %1896 = vmatpush3.bf16.msra.mxu0 %v1895_v29 }
  0xfd   : > { %1848 = vmatprep.subr.mxu0 %v2320_v1 }
  0xff   : > { %1826 = vmatmul.mubr.msk.f32.vlgmr.msra.gmra.mrb[2].mxu0 %vm543_vm1, %v531_v30 }
 0x100   : > { %1850 = vmatprep.mubr.msk.f32.mxu0 %vm2319_vm0, %v2320_v1 }
 0x1c9   : > { %v697_v17 = vpop.f32.mrb[0].mxu1 }
 0x1ca   : > { %v698_v19 = vadd.f32 %v1737_v16, %v697_v17  ;;  %v1816_v20 = vpop.f32.mrb[1].mxu1  ;;  %v613_v21 = vpop.f32.mrb[0].mxu0 }
 0x1cb   : > { %v1805_v22 = vpop.f32.mrb[1].mxu0  ;;  %v614_v23 = vadd.f32 %v1735_v18, %v613_v21 }
 0x1cc   : > { %795 = vrot.lane.b32.xlu1 %v698_v19, %s2321_s29  ;;  %793 = vrot.lane.b32.xlu0 %v698_v19, %s2322_s26 }
 0x1cd   : > { %1829 = vmatpush3.xpose.msk.msra.mxu1 %vm809_vm2, %v698_v19 }
 0x1ce   : > { %1833 = vmatprep.subr.mxu1 %v2320_v1 }
 0x1d0   : > { %1831 = vmatmul.mubr.msk.f32.vlgmr.msra.gmra.mrb[2].mxu1 %vm809_vm2, %v614_v23  ;;  %788 = vrot.lane.b32.xlu1 %v614_v23, %s2321_s29 }
 0x1d1   : > { %786 = vrot.lane.b32.xlu0 %v614_v23, %s2322_s26  ;;  %1835 = vmatprep.mubr.msk.f32.mxu1 %vm2319_vm0, %v2320_v1 }
 0x1d2   : > { %v781_v42 = vpop.f32.mrb[2].mxu0 }
 0x1d3   : > { %v782_v43 = vadd.f32 %v1739_v41, %v781_v42  ;;  %v1827_v44 = vpop.f32.mrb[3].mxu0 }
 0x1d4   : > { %790 = vrot.lane.b32.xlu1 %v614_v23, %s2323_s17 }
 0x1d5   : > { %797 = vrot.lane.b32.xlu0 %v698_v19, %s2323_s17  ;;  %1849 = vmatpush3.msra.mxu0 %v782_v43 }
 0x1d6   : > { %1858 = vmatprep.subr.mxu0 %v2320_v1 }
 0x23e   : > { %v794_v31 = vpop.permute.xlu0 %793  ;;  %v796_v32 = vpop.permute.xlu1 %795 }
 0x23f   : > { %1834 = vmatpush3.xpose.msk.msra.mxu1 %vm809_vm2, %v794_v31 }
 0x240   : > { %1838 = vmatprep.subr.mxu1 %v2320_v1 }
 0x242   : > { %v789_v34 = vpop.permute.xlu1 %788 }
 0x243   : > { %v787_v33 = vpop.permute.xlu0 %786 }
 0x244   : > { %1836 = vmatmul.mubr.msk.f32.vlgmr.msra.gmra.mrb[4].mxu1 %vm809_vm2, %v787_v33  ;;  %v1464_v33 = vld [vmem:[%s2920_s22 + $0x8] sm:$0xff] }
 0x245   : > { %1839 = vmatpush3.xpose.msk.msra.mxu1 %vm809_vm2, %v796_v32  ;;  %1840 = vmatprep.mubr.msk.f32.mxu1 %vm2319_vm0, %v2320_v1  ;;  %v1463_v32 = vld [vmem:[%s2920_s22] sm:$0xff] }
 0x246   : > { %1843 = vmatprep.subr.mxu1 %v2320_v1  ;;  %v791_v36 = vpop.permute.xlu1 %790 }
 0x247   : > { %v798_v35 = vpop.permute.xlu0 %797 }
 0x248   : > { %1841 = vmatmul.mubr.msk.f32.vlgmr.msra.gmra.mrb[6].mxu1 %vm809_vm2, %v789_v34  ;;  %v1898_v34 = vpack.c.bf16 %v1464_v33, %v1463_v32 }
 0x249   : > { %1844 = vmatpush3.xpose.msk.msra.mxu1 %vm809_vm2, %v798_v35  ;;  %1845 = vmatprep.mubr.msk.f32.mxu1 %vm2319_vm0, %v2320_v1  ;;  %v1466_v35 = vld [vmem:[%s2920_s22 + $0x18] sm:$0xff] }
 0x24a   : > { %1853 = vmatprep.subr.mxu1 %v2320_v1 }
 0x24c   : > { %1846 = vmatmul.mubr.msk.f32.vlgmr.msra.gmra.mrb[8].mxu1 %vm809_vm2, %v791_v36 }
 0x24d   : > { %1855 = vmatprep.mubr.msk.f32.mxu1 %vm2319_vm0, %v2320_v1 }
 0x2a3   : > { %v880_v37 = vpop.f32.mrb[2].mxu1 }
 0x2a4   : > { %v1106_v38 = vmul.f32 0.35355338, %v880_v37  ;;  %v1832_v39 = vpop.f32.mrb[3].mxu1 }
 0x2a6   : > { %v1110_v40 = vsel %vm809_vm2, %v1106_v38, -inf }
 0x2a7   : > { %1111 = vmax.xlane.f32.xlu0 %v1110_v40 }
 0x317   : > { %v954_v45 = vpop.f32.mrb[4].mxu1 }
 0x318   : > { %v1107_v46 = vmul.f32 0.35355338, %v954_v45  ;;  %v1837_v47 = vpop.f32.mrb[5].mxu1 }
 0x31a   : > { %v1113_v48 = vsel %vm809_vm2, %v1107_v46, -inf }
 0x31b   : > { %1114 = vmax.xlane.f32.xlu1 %v1113_v48  ;;  %v1028_v49 = vpop.f32.mrb[6].mxu1  ;;  %v1753_v48 = vld [vmem:[%s2922_s27] ss:$0 sm:$0xff] }
 0x31c   : > { %v1108_v50 = vmul.f32 0.35355338, %v1028_v49  ;;  %v1842_v51 = vpop.f32.mrb[7].mxu1 }
 0x31e   : > { %v1116_v52 = vsel %vm809_vm2, %v1108_v50, -inf }
 0x31f   : > { %1117 = vmax.xlane.f32.xlu0 %v1116_v52  ;;  %v1102_v53 = vpop.f32.mrb[8].mxu1 }
 0x320   : > { %v1109_v54 = vmul.f32 0.35355338, %v1102_v53  ;;  %v1847_v55 = vpop.f32.mrb[9].mxu1 }
 0x322   : > { %v1119_v56 = vsel %vm809_vm2, %v1109_v54, -inf }
 0x323   : > { %1120 = vmax.xlane.f32.xlu0 %v1119_v56 }
 0x32c   : > { %800 = vrot.lane.b32.xlu1 %v782_v43, %s2322_s26 }
 0x334   : > { %v1112_v57 = vpop.xlane.xlu0 %1111 }
 0x335   : > { %v1122_v58 = vsub.f32 %v1106_v38, %v1112_v57 }
 0x337   : > { %v1126_v59 = vmul.f32 1.442695, %v1122_v58 }
 0x339   : > { %2011 = vpow2.f32 %v1126_v59 }
 0x343   : > { %v2012_v60 = vpop.eup %2011 }
 0x344   : > { %v1134_v61 = vsel %vm809_vm2, %v2012_v60, 0.0 }
 0x350   : > { %1135 = vadd.xlane.f32.xlu1 %v1134_v61 }
 0x3a8   : > { %v1115_v62 = vpop.xlane.xlu1 %1114 }
 0x3a9   : > { %v1123_v63 = vsub.f32 %v1107_v46, %v1115_v62 }
 0x3ab   : > { %v1128_v2 = vmul.f32 1.442695, %v1123_v63 }
 0x3ac   : > { %v1118_v3 = vpop.xlane.xlu0 %1117  ;;  %v801_v4 = vpop.permute.xlu1 %800 }
 0x3ad   : > { %2013 = vpow2.f32 %v1128_v2  ;;  %v1124_v5 = vsub.f32 %v1108_v50, %v1118_v3  ;;  %1854 = vmatpush3.msra.mxu1 %v801_v4 }
 0x3ae   : > { %1863 = vmatprep.subr.mxu1 %v2320_v1 }
 0x3af   : > { %v1130_v6 = vmul.f32 1.442695, %v1124_v5 }
 0x3b0   : > { %v1121_v7 = vpop.xlane.xlu0 %1120 }
 0x3b1   : > { %2015 = vpow2.f32 %v1130_v6  ;;  %v1125_v8 = vsub.f32 %v1109_v54, %v1121_v7 }
 0x3b3   : > { %v1132_v9 = vmul.f32 1.442695, %v1125_v8 }
 0x3b5   : > { %2017 = vpow2.f32 %v1132_v9 }
 0x3b7   : > { %v2014_v10 = vpop.eup %2013 }
 0x3b8   : > { %v1137_v11 = vsel %vm809_vm2, %v2014_v10, 0.0 }
 0x3b9   : > { %1138 = vadd.xlane.f32.xlu0 %v1137_v11 }
 0x3bb   : > { %v2016_v12 = vpop.eup %2015 }
 0x3bc   : > { %v1140_v13 = vsel %vm809_vm2, %v2016_v12, 0.0 }
 0x3bd   : > { %1141 = vadd.xlane.f32.xlu1 %v1140_v13 }
 0x3bf   : > { %v2018_v14 = vpop.eup %2017 }
 0x3c0   : > { %v1143_v15 = vsel %vm809_vm2, %v2018_v14, 0.0 }
 0x3c1   : > { %1144 = vadd.xlane.f32.xlu0 %v1143_v15 }
 0x3ce   : > { %806 = vrot.lane.b32.xlu1 %v782_v43, %s2323_s17 }
 0x3d7   : > { %803 = vrot.lane.b32.xlu0 %v782_v43, %s2321_s29  ;;  %s1562_s29 = sshll.u32 %s528_s5, 4  ;;  %s2802_s29 = int_to_ptr.vmem [resolvable:$true] %s1562_s29 }
 0x3d8   : > { %s2229_s11 = scalar_lea.vmem %s2802_s29, 128  ;;  %p2236_p6 = scmp.lt.s32.totalorder %s2802_s29, %s2234_s21 }
 0x3d9   : > { %p2230_p9 = scmp.ne.s32.totalorder %s2802_s29, %s2229_s11  ;;  %p2237_p5 = scmp.lt.s32.totalorder %s2235_s15, %s2229_s11 }
 0x3db   : > { %p2231_p11 = pnand %p2230_p9, %p2924_p13  ;;  %p2238_p2 = por %p2237_p5, %p2236_p6 }
 0x3dd   : > { %v1136_v16 = vpop.xlane.xlu1 %1135  ;;  %p2232_p1 = pneg %p2231_p11 }
 0x3de   : > { %2019 = vrcp.f32 %v1136_v16 }
 0x3df   : > { %p2239_p4 = pnand %p2238_p2, %p2232_p1 }
 0x3e8   : > { %v2020_v17 = vpop.eup %2019 }
 0x3e9   : > { %v1147_v18 = vmul.f32 %v2020_v17, %v2012_v60 }
 0x3eb   : > { %1851 = vmatmul.mubr.msk.f32.vlgmr.msra.gmra.mrb[4].mxu0 %vm809_vm2, %v1147_v18 }
 0x3ec   : > { %1860 = vmatprep.mubr.msk.f32.mxu0 %vm2319_vm0, %v2320_v1 }
 0x446   : > { %v1139_v19 = vpop.xlane.xlu0 %1138 }
 0x447   : > { %2021 = vrcp.f32 %v1139_v19 }
 0x44a   : > { %v1142_v20 = vpop.xlane.xlu1 %1141 }
 0x44b   : > { %2023 = vrcp.f32 %v1142_v20 }
 0x44e   : > { %v1145_v21 = vpop.xlane.xlu0 %1144  ;;  %v807_v25 = vpop.permute.xlu1 %806 }
 0x44f   : > { %2025 = vrcp.f32 %v1145_v21 }
 0x451   : > { %v2022_v22 = vpop.eup %2021 }
 0x452   : > { %v1149_v23 = vmul.f32 %v2022_v22, %v2014_v10  ;;  %v804_v24 = vpop.permute.xlu0 %803 }
 0x453   : > { %1859 = vmatpush3.msra.mxu0 %v804_v24 }
 0x454   : > { %1856 = vmatmul.mubr.msk.f32.vlgmr.msra.gmra.mrb[10].mxu1 %vm809_vm2, %v1149_v23  ;;  %1897 = vmatprep.subr.bf16.mxu0 %v2318_v0 }
 0x455   : > { %v2024_v26 = vpop.eup %2023  ;;  %1864 = vmatpush3.msra.mxu1 %v807_v25  ;;  %1865 = vmatprep.mubr.msk.f32.mxu1 %vm2319_vm0, %v2320_v1 }
 0x456   : > { %v1151_v27 = vmul.f32 %v2024_v26, %v2016_v12 }
 0x458   : > { %1861 = vmatmul.mubr.msk.f32.vlgmr.msra.gmra.mrb[6].mxu0 %vm809_vm2, %v1151_v27 }
 0x459   : > { %v2026_v28 = vpop.eup %2025  ;;  %1876 = vmatprep.mubr.msk.f32.mxu0 %vm2319_vm0, %v2320_v1  ;;  %1899 = vmatpush3.bf16.msra.mxu0 %v1898_v34  ;;  %v1465_v1 = vld [vmem:[%s2920_s22 + $0x10] sm:$0xff] }
 0x45a   : > { %v1153_v29 = vmul.f32 %v2026_v28, %v2018_v14  ;;  %1900 = vmatprep.subr.bf16.mxu0 %v2318_v0  ;;  %v1901_v36 = vpack.c.bf16 %v1466_v35, %v1465_v1 }
 0x45c   : > { %1866 = vmatmul.mubr.msk.f32.vlgmr.msra.gmra.mrb[12].mxu1 %vm809_vm2, %v1153_v29 }
 0x45d   : > { %1902 = vmatpush3.bf16.msra.mxu0 %v1901_v36 }
 0x4be   : > { %v1223_v30 = vpop.f32.mrb[4].mxu0 }
 0x4bf   : > { %v1852_v31 = vpop.f32.mrb[5].mxu0 }
 0x527   : > { %v1296_v37 = vpop.f32.mrb[10].mxu1 }
 0x528   : > { %1447 = vrot.lane.b32.xlu1 %v1296_v37, %s2324_s24  ;;  %v1857_v38 = vpop.f32.mrb[11].mxu1 }
 0x52b   : > { %v1369_v39 = vpop.f32.mrb[6].mxu0 }
 0x52c   : > { %1451 = vrot.lane.b32.xlu0 %v1369_v39, %s2325_s30  ;;  %v1862_v40 = vpop.f32.mrb[7].mxu0 }
 0x52f   : > { %v1442_v0 = vpop.f32.mrb[12].mxu1 }
 0x530   : > { %1455 = vrot.lane.b32.xlu1 %v1442_v0, %s2326_s12  ;;  %v1867_v41 = vpop.f32.mrb[13].mxu1 }
 0x59a   : > { %v1448_v42 = vpop.permute.xlu1 %1447 }
 0x59b   : > { %v1458_v44 = vsel %vm809_vm2, %v1223_v30, %v1448_v42 }
 0x59e   : > { %v1452_v43 = vpop.permute.xlu0 %1451 }
 0x59f   : > { %v1460_v45 = vsel %vm1459_vm3, %v1458_v44, %v1452_v43 }
 0x5a2   : > { %v1456_v46 = vpop.permute.xlu1 %1455 }
 0x5a3   : > { %v1462_v47 = vsel %vm1461_vm4, %v1460_v45, %v1456_v46 }
 0x5a4   : > { %1877 = vmatmul.mubr.msk.f32.vlgmr.msra.gmra.mrb[8].mxu0 %vm543_vm1, %v1462_v47 }
 0x677   : > { %v1543_v49 = vpop.f32.mrb[8].mxu0 }
 0x678   : > { %v1544_v50 = vadd.f32 %v1753_v48, %v1543_v49  ;;  %v1878_v51 = vpop.f32.mrb[9].mxu0 }
 0x67a   : > { %1547 = vst.msk [vmem:[%s528_s5] sm:$0xff] %vm543_vm1, %v1544_v50 }
 0x67b   : > { %2242 = shalt.err (!%p2239_p4)
}
 0x67c   : > { %s2243_s25 = scalar_lea.hbm %s2800_s20, 128  ;;  %s2247_s6 = scalar_lea.hbm %s2923_s14, 256 }
 0x67d   : > { %p2244_p10 = scmp.ne.s32.totalorder %s2800_s20, %s2243_s25  ;;  %p2248_p12 = scmp.lt.u32.totalorder %s2800_s20, %s2923_s14 }
 0x67e   : > { %p2249_p0 = scmp.lt.u32.totalorder %s2247_s6, %s2243_s25  ;;  %p2251_p9 = scmp.lt.u32.totalorder %s2243_s25, %s2800_s20 }
 0x67f   : > { %p2245_p3 = pnand %p2244_p10, %p2924_p13 }
 0x680   : > { %p2250_p7 = por %p2249_p0, %p2248_p12 }
 0x681   : > { %p2246_p8 = pneg %p2245_p3 }
 0x682   : > { %p2252_p11 = por %p2251_p9, %p2250_p7 }
 0x684   : > { %p2253_p1 = pnand %p2252_p11, %p2246_p8 }
 0x686   : > { %2256 = shalt.err (!%p2253_p1)
}
 0x687   : > { %1925 = dma.vmem_to_hbm [thread:$0]  (%p2924_p13), %s2802_s29, 128, %s2800_s20, %s1549_s10  }
 0x688 PF: > { %s2925_s12 = sld [smem:[#allocation20_spill]]  ;;  %s2926_s16 = sld [smem:[#allocation25_spill]] }
 0x689   : > { %s2927_s28 = sld [smem:[#allocation21_spill]] }
 0x68e   : > { %s1574_s27 = sand.u32 1, %s2925_s12   ;;  %p2928_p6 = scmp.ne.s32.totalorder %s2926_s16, 0 }
 0x68f   : > { %p2929_p5 = scmp.ge.s32.totalorder %s2927_s28, 2  ;;  %s1575_s13 = scalar_lea.sflag [#allocation4], %s1574_s27 }
 0x691   : > { %p1951_p2 = pnand %p2929_p5, %p2928_p6 }
 0x693   : > { %2290 = dma.done.wait (!%p1951_p2), %s1575_s13, 128  }
 0x694   : > { %2292 = vsyncadd (!%p1951_p2), %s1575_s13, 4294967168  ;;  %s2930_s20 = sld [smem:[#allocation22_spill]]  ;;  %s2931_s5 = sld [smem:[#allocation23_spill]] }
 0x695   : > { %s2932_s17 = smov %s2299_s18  ;;  %s2933_s18 = smov %s2303_s19 }
 0x69a   : > { %p29_p4 = scmp.ge.s32.totalorder %s2930_s20, 4   ;;  %s2934_s19 = smov %s2931_s5 }
 0x69c   :  { %31 = sbr.rel (!%p29_p4) target bundleno = 17 (0x11), region = 149 }
 0x6a3   :  { %1580 = vsyncpa [#allocation3], 1 }
 0x6a4   :  { %1582 = vsyncpa [#allocation3 + $0x1], 1 }
 0x6a5   :  { %1583 = vsyncpa [#allocation6], 1 }
 0x6a6   :  { %1585 = vsyncpa [#allocation6 + $0x1], 1 }
 0x6a7   :  { %1586 = vsyncpa [#allocation9], 1 }
 0x6a8   :  { %1587 = vsyncpa [#allocation12], 1 }
 0x6a9   :  { %1588 = vsyncpa [#allocation4], 1 }
 0x6aa   :  { %1590 = vsyncpa [#allocation4 + $0x1], 1 }

</bundles_post_ra>
